<compile_context>
chip_gen: v6e
topology: v6e:2x2x1
jax: 0.10.0
libtpu: 0.0.40
codegen_flags: <defaults>
</compile_context>

<pallas_src>
import functools

import jax
import jax.numpy as jnp
from jax import lax
from jax.experimental import pallas as pl
from jax.experimental.pallas import tpu as pltpu

LANE = 128
SUBLANE = 8
DEFAULT_TILE_BYTES = 4 * 1024 * 1024     # ~4 MiB per input block
MIN_SPLIT_BYTES = 256 * 1024             # force >=2 grid steps above this size
VMEM_LIMIT_BYTES = 32 * 1024 * 1024      # explicit: legal on v5e/v6e/v7x


def _sublane_multiple(dtype):
    """Minimum second-to-last-dim multiple for this dtype (8/16/32)."""
    itemsize = jnp.dtype(dtype).itemsize
    return max(SUBLANE, SUBLANE * (4 // itemsize))


def _round_up(x, m):
    return -(-x // m) * m


def _excluded_volume_kernel(coef_ref, x_ref, o_ref, *, power, newton_steps):
    # coef_ref: (1,) f32 in SMEM, coef = 4 * epsilon * sigma**power
    coef = coef_ref[0]
    r = x_ref[...].astype(jnp.float32)          # native-dtype tile, math in f32
    p = lax.integer_pow(r, power)               # ~log2(power) VALU mults
    inv = pl.reciprocal(p, approx=True)         # EUP slot (free under HBM bound)
    for _ in range(newton_steps):               # static unroll (1 or 2 steps)
        inv = inv * (2.0 - p * inv)
    o_ref[...] = (coef * inv).astype(o_ref.dtype)


def _run_pallas(x2d, coef, power, br):
    rows = x2d.shape[0]
    dtype = x2d.dtype
    itemsize = jnp.dtype(dtype).itemsize
    # 2 Newton steps for f32 outputs (rtol 1e-5), 1 for low-precision outputs.
    newton_steps = 2 if itemsize >= 4 else 1
    n_elems = rows * LANE

    kernel = functools.partial(
        _excluded_volume_kernel, power=power, newton_steps=newton_steps)

    cost = pl.CostEstimate(
        flops=(max(int(power).bit_length(), 1) + 2 * newton_steps + 1) * n_elems,
        transcendentals=n_elems,
        bytes_accessed=2 * n_elems * itemsize,
    )

    return pl.pallas_call(
        kernel,
        out_shape=jax.ShapeDtypeStruct((rows, LANE), dtype),
        grid=(pl.cdiv(rows, br),),
        in_specs=[
            pl.BlockSpec(memory_space=pltpu.MemorySpace.SMEM),   # coef (1,)
            pl.BlockSpec((br, LANE), lambda i: (i, 0)),          # x tile
        ],
        out_specs=pl.BlockSpec((br, LANE), lambda i: (i, 0)),
        compiler_params=pltpu.CompilerParams(
            dimension_semantics=("parallel",),      # shard across v7x TCs
            vmem_limit_bytes=VMEM_LIMIT_BYTES,
        ),
        cost_estimate=cost,
    )(coef, x2d)


def excluded_volume(x, sigma, epsilon, power=12, *, tile_rows=None):
    """JAX/Pallas equivalent of ExcludedVolume.forward.

    x       : any-shape float array (e.g. NCHW pairwise distances), any float dtype
    sigma   : shape (1,) float parameter
    epsilon : shape (1,) float parameter
    """
    orig_shape = x.shape
    dtype = x.dtype
    n = x.size
    itemsize = jnp.dtype(dtype).itemsize
    mult = _sublane_multiple(dtype)

    # Fold the scalar parameters once (tiny scalar op, outside the kernel).
    # Note: folding sigma**power in f32 can over/underflow for extreme sigma;
    # negligible for sigma ~ 1 (the module default).
    sigma_f = jnp.asarray(sigma, jnp.float32).reshape(-1)
    eps_f = jnp.asarray(epsilon, jnp.float32).reshape(-1)
    coef = 4.0 * eps_f * sigma_f ** power       # shape (1,)

    xf = x.reshape(-1)                          # free (contiguous, no copy)
    rem = n % LANE
    n_main = n - rem
    rows = n_main // LANE

    main_out = None
    if rows > 0:
        x2d = (xf[:n_main] if rem else xf).reshape(rows, LANE)

        # --- choose block rows ---
        if tile_rows is None:
            t = DEFAULT_TILE_BYTES // (LANE * itemsize)
        else:
            t = int(tile_rows)
        tile_max = max(mult, (t // mult) * mult)

        if rows <= mult:
            br = rows                            # single full-dims block
        elif rows * LANE * itemsize >= MIN_SPLIT_BYTES:
            # Ensure >=2 grid steps so both v7x TensorCores get work.
            br = min(tile_max, _round_up(-(-rows // 2), mult))
        elif rows <= tile_max:
            br = rows                            # single full-dims block
        else:
            br = tile_max                        # ragged last block is fine

        main_out = _run_pallas(x2d, coef, power, br).reshape(-1)

    if rem:
        # <128-element tail: plain jnp (no full-array pad, no full-output slice).
        tail = xf[n_main:].astype(jnp.float32)
        tail_out = (coef[0] / lax.integer_pow(tail, power)).astype(dtype)
        out_flat = (jnp.concatenate([main_out, tail_out])
                    if main_out is not None else tail_out)
    else:
        out_flat = main_out

    return out_flat.reshape(orig_shape)


def excluded_volume_ref(x, sigma, epsilon, power=12):
    """Plain-JAX reference matching the PyTorch module."""
    return 4.0 * epsilon * (sigma / x) ** power


if __name__ == "__main__":
    k0, k1, k2 = jax.random.split(jax.random.PRNGKey(0), 3)

    # Parameters mirroring __init__(sigma=1.0, epsilon=1.0, power=12)
    sigma = jnp.array([1.0], dtype=jnp.float32)
    epsilon = jnp.array([1.0], dtype=jnp.float32)
    power = 12

    # 1) Main case: distance-like (strictly positive) NCHW input [2, 4, 16, 16].
    x = 0.8 + jax.random.uniform(k0, (2, 4, 16, 16), dtype=jnp.float32) * 1.5
    out = jax.block_until_ready(excluded_volume(x, sigma, epsilon, power))
    ref = excluded_volume_ref(x, sigma, epsilon, power)
    assert out.shape == x.shape and out.dtype == x.dtype
    assert jnp.allclose(out, ref, rtol=1e-5, atol=1e-5), "mismatch vs reference (f32)"

    # 2) Ragged-grid path: rows=20 with tile_rows=8 -> grid=3, ragged last block.
    x2 = 0.8 + jax.random.uniform(k1, (1, 1, 20, 128), dtype=jnp.float32) * 1.5
    out2 = jax.block_until_ready(
        excluded_volume(x2, sigma, epsilon, power, tile_rows=8))
    ref2 = excluded_volume_ref(x2, sigma, epsilon, power)
    assert jnp.allclose(out2, ref2, rtol=1e-5, atol=1e-5), "mismatch (ragged grid)"

    # 3) Native low-precision + misaligned path: bf16 in / bf16 out, flat
    #    length 231 -> aligned prefix through the kernel, 103-element jnp tail.
    x3 = (0.8 + jax.random.uniform(k2, (3, 7, 11), dtype=jnp.float32) * 1.5
          ).astype(jnp.bfloat16)
    out3 = jax.block_until_ready(excluded_volume(x3, sigma, epsilon, power))
    ref3 = excluded_volume_ref(x3.astype(jnp.float32), sigma, epsilon, power)
    assert out3.shape == x3.shape and out3.dtype == jnp.bfloat16
    assert jnp.allclose(out3.astype(jnp.float32), ref3, rtol=2e-2, atol=1e-2), \
        "mismatch vs reference (bf16)"

    print("KERNEL_OK")
</pallas_src>

<mosaic_0001>
module attributes {stable_mosaic.version = 11 : i64} {
  func.func @_excluded_volume_kernel(%arg0: i32, %arg1: memref<1xf32, #tpu.memory_space<smem>>, %arg2: memref<16x128xf32, #tpu.memory_space<vmem>>, %arg3: memref<16x128xf32, #tpu.memory_space<vmem>>) attributes {dimension_semantics = [#tpu.dimension_semantics<parallel>], iteration_bounds = array<i64: 1>, scalar_prefetch = 0 : i64, scratch_operands = 0 : i64, tpu.core_type = #tpu.core_type<tc>, window_params = [{transform_indices = @transform_0, window_bounds = array<i64: 1>}, {transform_indices = @transform_1, window_bounds = array<i64: 16, 128>}, {transform_indices = @transform_2, window_bounds = array<i64: 16, 128>}]} {
    %c0 = arith.constant 0 : index
    %0 = memref.load %arg1[%c0] : memref<1xf32, #tpu.memory_space<smem>>
    %c0_0 = arith.constant 0 : index
    %c0_1 = arith.constant 0 : index
    %1 = vector.load %arg2[%c0_0, %c0_1] : memref<16x128xf32, #tpu.memory_space<vmem>>, vector<16x128xf32>
    %2 = arith.mulf %1, %1 : vector<16x128xf32>
    %3 = arith.mulf %2, %2 : vector<16x128xf32>
    %4 = arith.mulf %3, %3 : vector<16x128xf32>
    %5 = arith.mulf %3, %4 : vector<16x128xf32>
    %6 = tpu.reciprocal %5 {approx = true} : vector<16x128xf32> -> vector<16x128xf32>
    %7 = arith.mulf %5, %6 : vector<16x128xf32>
    %cst = arith.constant 2.000000e+00 : f32
    %8 = vector.broadcast %cst : f32 to vector<16x128xf32>
    %9 = arith.subf %8, %7 : vector<16x128xf32>
    %10 = arith.mulf %6, %9 : vector<16x128xf32>
    %11 = arith.mulf %5, %10 : vector<16x128xf32>
    %cst_2 = arith.constant 2.000000e+00 : f32
    %12 = vector.broadcast %cst_2 : f32 to vector<16x128xf32>
    %13 = arith.subf %12, %11 : vector<16x128xf32>
    %14 = arith.mulf %10, %13 : vector<16x128xf32>
    %15 = vector.broadcast %0 : f32 to vector<16x128xf32>
    %16 = arith.mulf %15, %14 : vector<16x128xf32>
    %c0_3 = arith.constant 0 : index
    %c0_4 = arith.constant 0 : index
    %17 = vector.load %arg3[%c0_3, %c0_4] : memref<16x128xf32, #tpu.memory_space<vmem>>, vector<16x128xf32>
    tpu.vector_store %arg3[%c0_3, %c0_4], %16 {strides = array<i32>} : memref<16x128xf32, #tpu.memory_space<vmem>>, vector<16x128xf32>,
    return
  }
  func.func @transform_0(%arg0: i32) -> i32 {
    %c0_i32 = arith.constant 0 : i32
    %c0_i32_0 = arith.constant 0 : i32
    return %c0_i32 : i32
  }
  func.func @transform_1(%arg0: i32) -> (i32, i32) {
    %c0_i32 = arith.constant 0 : i32
    %c0_i32_0 = arith.constant 0 : i32
    return %arg0, %c0_i32 : i32, i32
  }
  func.func @transform_2(%arg0: i32) -> (i32, i32) {
    %c0_i32 = arith.constant 0 : i32
    %c0_i32_0 = arith.constant 0 : i32
    return %arg0, %c0_i32 : i32, i32
  }
}

</mosaic_0001>

<bundles_post_ra>
// kernel: tpu_custom_call.1
= control target key start
LH: loop header
LB: loop body
LE: loop exit
PB: predicated region body
PF: predicated region fallthrough
CT: control target
= control target key end

     0   :  { %8 = vsyncpa [#allocation4], 0  ;;  %s160_s0 = inlined_call_operand.<no memory space> [shape: f32[1], index: 0, kind: input, shape index: {}]   ;;  %s161_s1 = inlined_call_operand.hbm [shape: f32[16,128], index: 1, kind: input, shape index: {}]   ;;  %s162_s2 = inlined_call_operand.hbm [shape: f32[16,128], index: 2, kind: output, shape index: {}]  }
   0x1   :  { %9 = vsyncpa [#allocation5], 0  ;;  %s126_s9 = smov [#allocation3]  }
   0x2   :  { %s17_s10 = sshll.u32 %s126_s9, 4  ;;  %s18_s10 = int_to_ptr.vmem [resolvable:$true] %s17_s10 }
   0x3   :  { %s90_s11 = scalar_lea.vmem %s18_s10, 256  ;;  %p95_p1 = scmp.lt.s32.totalorder %s18_s10, %s18_s10 }
   0x4   :  { %p91_p0 = scmp.ne.s32.totalorder %s18_s10, %s90_s11  ;;  %p96_p2 = scmp.lt.s32.totalorder %s90_s11, %s90_s11 }
   0x6   :  { %p97_p3 = por %p96_p2, %p95_p1 }
   0x8   :  { %p98_p4 = pnand %p97_p3, %p91_p0 }
   0xa   :  { %101 = shalt.err (!%p98_p4)
}
   0xb   :  { %s127_s12 = smov 128   ;;  %s128_s13 = smov 8  }
   0xc   :  { %23 = dma.hbm_to_vmem [thread:$0]  %s161_s1, 256, %s18_s10, [#allocation4], %s127_s12, %s127_s12, %s128_s13  }
   0xd   :  { %122 = dma.done.wait [#allocation4], 256  }
   0xe   :  { %123 = vsyncadd [#allocation4], 4294967040  ;;  %v28_v0 = vld [vmem:[#allocation3] sm:$0xff]  ;;  %v29_v1 = vld [vmem:[#allocation3 + $0x8] sm:$0xff]  ;;  %v52_v21 = vstv %s160_s0  ;;  %s129_s17 = smov [#allocation6]  }
   0xf   :  { %v30_v2 = vmul.f32 %v28_v0, %v28_v0  ;;  %v31_v3 = vmul.f32 %v29_v1, %v29_v1  ;;  %s62_s18 = sshll.u32 %s129_s17, 4  ;;  %s63_s18 = int_to_ptr.vmem [resolvable:$true] %s62_s18 }
  0x10   :  { %s102_s19 = scalar_lea.vmem %s63_s18, 256  ;;  %p107_p6 = scmp.lt.s32.totalorder %s63_s18, %s63_s18 }
  0x11   :  { %v32_v4 = vmul.f32 %v30_v2, %v30_v2  ;;  %v33_v5 = vmul.f32 %v31_v3, %v31_v3  ;;  %p103_p5 = scmp.ne.s32.totalorder %s63_s18, %s102_s19  ;;  %p108_p7 = scmp.lt.s32.totalorder %s102_s19, %s102_s19 }
  0x13   :  { %v34_v6 = vmul.f32 %v32_v4, %v32_v4  ;;  %v35_v7 = vmul.f32 %v33_v5, %v33_v5  ;;  %p109_p8 = por %p108_p7, %p107_p6 }
  0x15   :  { %v36_v8 = vmul.f32 %v34_v6, %v32_v4  ;;  %v37_v9 = vmul.f32 %v35_v7, %v33_v5  ;;  %p110_p9 = pnand %p109_p8, %p103_p5 }
  0x17   :  { %78 = vrcp.f32 %v36_v8 }
  0x18   :  { %80 = vrcp.f32 %v37_v9 }
  0x24   :  { %v79_v10 = vpop.eup %78 }
  0x25   :  { %v81_v11 = vpop.eup %80  ;;  %v40_v12 = vmul.f32 %v79_v10, %v36_v8 }
  0x26   :  { %v41_v13 = vmul.f32 %v81_v11, %v37_v9 }
  0x27   :  { %v42_v14 = vsub.f32 2.0, %v40_v12 }
  0x28   :  { %v43_v15 = vsub.f32 2.0, %v41_v13 }
  0x29   :  { %v44_v16 = vmul.f32 %v79_v10, %v42_v14 }
  0x2a   :  { %v45_v17 = vmul.f32 %v81_v11, %v43_v15 }
  0x2b   :  { %v46_v18 = vmul.f32 %v44_v16, %v36_v8 }
  0x2c   :  { %v47_v19 = vmul.f32 %v45_v17, %v37_v9 }
  0x2d   :  { %v48_v20 = vsub.f32 2.0, %v46_v18 }
  0x2e   :  { %v49_v22 = vsub.f32 2.0, %v47_v19 }
  0x2f   :  { %v50_v23 = vmul.f32 %v48_v20, %v44_v16 }
  0x30   :  { %v51_v24 = vmul.f32 %v49_v22, %v45_v17 }
  0x31   :  { %v53_v25 = vmul.f32 %v52_v21, %v50_v23 }
  0x32   :  { %v54_v26 = vmul.f32 %v52_v21, %v51_v24 }
  0x33   :  { %55 = vst [vmem:[#allocation6] sm:$0xff] %v53_v25 }
  0x34   :  { %56 = vst [vmem:[#allocation6 + $0x8] sm:$0xff] %v54_v26 }
  0x35   :  { %113 = shalt.err (!%p110_p9)
}
  0x36   :  { %68 = dma.vmem_to_hbm [thread:$0]  %s63_s18, 256, %s162_s2, [#allocation5], %s127_s12, %s127_s12, %s128_s13  }
  0x37   :  { %124 = dma.done.wait [#allocation5], 256  }
  0x38   :  { %125 = vsyncadd [#allocation5], 4294967040 }
  0x39   :  { %72 = vsyncpa [#allocation4], 1 }
  0x3a   :  { %73 = vsyncpa [#allocation5], 1 }

</bundles_post_ra>
